<compile_context>
chip_gen: v6e
topology: v6e:2x2x1
jax: 0.10.0
libtpu: 0.0.40
codegen_flags: <defaults>
</compile_context>

<pallas_src>
import numpy as np
import jax
import jax.numpy as jnp
from jax.experimental import pallas as pl
from jax.experimental.pallas import tpu as pltpu

LANE = 128  # TPU lane width (internal-only feature dims padded to this)
SUB = 8     # f32 sublane packing; all HBM-facing arrays are f32


def _round_up(x, m):
    return ((x + m - 1) // m) * m


# ----------------------------- Pallas kernel ---------------------------------
def _make_kernel(n_layers, n_enc, compute_dtype):
    """Fused dense autoencoder forward: n_layers x (matmul + bias + ReLU) per batch tile."""

    def kernel(x_ref, *refs):
        wb = refs[: 2 * n_layers]                      # (w0, b0, w1, b1, ...)
        dec_ref = refs[2 * n_layers]
        enc_ref = refs[2 * n_layers + 1]

        # f32 block straight from HBM; any cast happens on the VPU in VMEM (free here).
        h = x_ref[...].astype(compute_dtype)           # (TB, input_dim)
        for li in range(n_layers):
            w = wb[2 * li][...]                        # (p_in, p_out), compute_dtype
            b = wb[2 * li + 1][...]                    # (1, p_out), f32
            y = jnp.dot(h, w, preferred_element_type=jnp.float32) + b
            act = jnp.maximum(y, 0.0)                  # bias add + ReLU in f32
            if li == n_enc - 1:
                enc_ref[...] = act.astype(enc_ref.dtype)   # encoded, logical width
            h = act.astype(compute_dtype) if li < n_layers - 1 else act
        dec_ref[...] = h.astype(dec_ref.dtype)             # decoded, logical width

    return kernel


# ------------------------------- wrapper --------------------------------------
def autoencoder_forward(x, params, *, block_batch=1024, compute_dtype=jnp.float32):
    """params = [(W, b), ...] with W as (in, out), b as (1, out); returns (decoded, encoded)."""
    batch, input_dim = x.shape
    n_layers = len(params)
    n_enc = n_layers // 2
    compressed_dim = params[n_enc - 1][0].shape[1]

    # ---- batch tiling -------------------------------------------------------
    # Big tiles amortize per-grid-step overhead (~0.35 us/step); cap so batches that
    # allow it still get >= 2 grid steps (v7x has 2 TensorCores on the parallel axis).
    tb = min(block_batch, _round_up(batch, SUB))
    if batch >= 2 * SUB:
        tb = min(tb, _round_up(pl.cdiv(batch, 2), SUB))
    tb = _round_up(tb, SUB)
    grid = (pl.cdiv(batch, tb),)   # partial last block handled by Pallas masking

    # ---- feature-dim padding --------------------------------------------------
    # Boundary widths between layers.  HBM-facing boundaries (network input, encoded,
    # decoded) keep their logical width so x/decoded/encoded are read/written at exactly
    # their logical sizes (no extra HBM bytes, no wrapper pad/slice passes).  Purely
    # internal boundaries are padded to 128 lanes so in-VMEM matmul operands stay
    # lane-dense; padded lanes remain exactly zero (zero weight rows/cols + zero bias
    # + ReLU), so numerics are unchanged.
    bounds = [input_dim] + [w.shape[1] for w, _ in params]
    hbm_facing = {0, n_enc, n_layers}
    pads = [d if j in hbm_facing else _round_up(d, LANE) for j, d in enumerate(bounds)]

    flat = []
    in_specs = [pl.BlockSpec((tb, input_dim), lambda i: (i, 0))]   # batch-tiled input
    for li, (w, b) in enumerate(params):
        fi, fo = w.shape
        fi_p, fo_p = pads[li], pads[li + 1]
        w_p = jnp.zeros((fi_p, fo_p), compute_dtype).at[:fi, :fo].set(w.astype(compute_dtype))
        b_p = jnp.zeros((1, fo_p), jnp.float32).at[:, :fo].set(b.astype(jnp.float32))
        flat += [w_p, b_p]
        # Constant block index -> weights/biases stay VMEM-resident across all batch tiles.
        # TODO(synk): if feature dims ever grow large, add pipeline_mode=pl.Buffered(1)
        # on these grid-invariant operands to save double-buffer VMEM (v7x has 64 MiB).
        in_specs += [pl.BlockSpec((fi_p, fo_p), lambda i: (0, 0)),
                     pl.BlockSpec((1, fo_p), lambda i: (0, 0))]

    kernel = _make_kernel(n_layers, n_enc, compute_dtype)

    flops = 2 * batch * sum(int(w.shape[0]) * int(w.shape[1]) for w, _ in params)
    param_bytes = sum(int(a.size) * a.dtype.itemsize for a in flat)
    bytes_accessed = int(4 * batch * (2 * input_dim + compressed_dim) + param_bytes)

    decoded, encoded = pl.pallas_call(
        kernel,
        out_shape=(
            jax.ShapeDtypeStruct((batch, input_dim), jnp.float32),       # decoded
            jax.ShapeDtypeStruct((batch, compressed_dim), jnp.float32),  # encoded
        ),
        grid=grid,
        in_specs=in_specs,
        out_specs=(
            pl.BlockSpec((tb, input_dim), lambda i: (i, 0)),
            pl.BlockSpec((tb, compressed_dim), lambda i: (i, 0)),
        ),
        compiler_params=pltpu.CompilerParams(
            dimension_semantics=("parallel",),       # megacore sharding on v7x
            vmem_limit_bytes=32 * 1024 * 1024,
        ),
        cost_estimate=pl.CostEstimate(
            flops=flops, transcendentals=0, bytes_accessed=bytes_accessed),
    )(x, *flat)

    return decoded, encoded


# --------------------------- parameter construction ---------------------------
def build_params(input_dim, compression_factor, num_hidden_layers, key):
    """Deterministic synthetic weights, shapes identical to the PyTorch module."""
    compressed_dim = max(1, int(input_dim / compression_factor))
    layer_sizes = np.linspace(input_dim, compressed_dim, num_hidden_layers + 1, dtype=int)

    enc_sizes = list(layer_sizes)            # e.g. [64, 40, 16]
    dec_sizes = list(reversed(layer_sizes))  # e.g. [16, 40, 64]

    params = []
    for sizes in (enc_sizes, dec_sizes):
        for i in range(len(sizes) - 1):
            fan_in, fan_out = int(sizes[i]), int(sizes[i + 1])
            key, kw, kb = jax.random.split(key, 3)
            bound = 1.0 / np.sqrt(fan_in)
            # W stored as (in, out) — transposed vs torch's (out, in); math identical.
            w = jax.random.uniform(kw, (fan_in, fan_out), jnp.float32, -bound, bound)
            b = jax.random.uniform(kb, (1, fan_out), jnp.float32, -bound, bound)
            params.append((w, b))
    return params, compressed_dim


def reference_forward(x, params):
    """Plain-JAX reference for correctness checking."""
    n_enc = len(params) // 2
    h = x
    enc = None
    for i, (w, b) in enumerate(params):
        h = jnp.maximum(h @ w + b, 0.0)
        if i == n_enc - 1:
            enc = h
    return h, enc


# ----------------------------------- main --------------------------------------
if __name__ == "__main__":
    # TODO(synk): only the layer_type='dense', activation='relu' configuration is implemented.
    input_dim = 64
    compression_factor = 4
    num_hidden_layers = 2
    batch = 8

    key = jax.random.PRNGKey(0)
    key, kx = jax.random.split(key)
    x = jax.random.normal(kx, (batch, input_dim), jnp.float32)
    params, compressed_dim = build_params(input_dim, compression_factor, num_hidden_layers, key)

    # Small batch, f32, single grid step — exact check vs reference.
    decoded, encoded = autoencoder_forward(x, params)
    decoded, encoded = jax.block_until_ready((decoded, encoded))
    dec_r, enc_r = reference_forward(x, params)
    assert decoded.shape == (batch, input_dim)
    assert encoded.shape == (batch, compressed_dim)
    np.testing.assert_allclose(np.asarray(decoded), np.asarray(dec_r), rtol=1e-5, atol=1e-5)
    np.testing.assert_allclose(np.asarray(encoded), np.asarray(enc_r), rtol=1e-5, atol=1e-5)

    # Non-divisible batch, f32 — exercises the 2-step grid with a partial last block.
    key, kx1 = jax.random.split(key)
    x_odd = jax.random.normal(kx1, (300, input_dim), jnp.float32)
    dec_o, enc_o = jax.block_until_ready(autoencoder_forward(x_odd, params))
    dec_or, enc_or = reference_forward(x_odd, params)
    np.testing.assert_allclose(np.asarray(dec_o), np.asarray(dec_or), rtol=1e-5, atol=1e-5)
    np.testing.assert_allclose(np.asarray(enc_o), np.asarray(enc_or), rtol=1e-5, atol=1e-5)

    # Larger batch, bf16 compute (f32 HBM I/O, in-kernel cast) — pipelined 2-tile grid.
    key, kx2 = jax.random.split(key)
    x_big = jax.random.normal(kx2, (512, input_dim), jnp.float32)
    dec_b, enc_b = jax.block_until_ready(
        autoencoder_forward(x_big, params, compute_dtype=jnp.bfloat16))
    dec_br, enc_br = reference_forward(x_big, params)
    np.testing.assert_allclose(np.asarray(dec_b), np.asarray(dec_br), rtol=5e-2, atol=5e-2)
    np.testing.assert_allclose(np.asarray(enc_b), np.asarray(enc_br), rtol=5e-2, atol=5e-2)

    print("KERNEL_OK")
</pallas_src>

<mosaic_0001>
module attributes {stable_mosaic.version = 11 : i64} {
  func.func @kernel(%arg0: i32, %arg1: memref<8x64xf32, #tpu.memory_space<vmem>>, %arg2: memref<64x128xf32, #tpu.memory_space<vmem>>, %arg3: memref<1x128xf32, #tpu.memory_space<vmem>>, %arg4: memref<128x16xf32, #tpu.memory_space<vmem>>, %arg5: memref<1x16xf32, #tpu.memory_space<vmem>>, %arg6: memref<16x128xf32, #tpu.memory_space<vmem>>, %arg7: memref<1x128xf32, #tpu.memory_space<vmem>>, %arg8: memref<128x64xf32, #tpu.memory_space<vmem>>, %arg9: memref<1x64xf32, #tpu.memory_space<vmem>>, %arg10: memref<8x64xf32, #tpu.memory_space<vmem>>, %arg11: memref<8x16xf32, #tpu.memory_space<vmem>>) attributes {dimension_semantics = [#tpu.dimension_semantics<parallel>], iteration_bounds = array<i64: 1>, scalar_prefetch = 0 : i64, scratch_operands = 0 : i64, tpu.core_type = #tpu.core_type<tc>, window_params = [{transform_indices = @transform_0, window_bounds = array<i64: 8, 64>}, {pipeline_mode = #tpu.pipeline_mode<synchronous>, transform_indices = @transform_1, window_bounds = array<i64: 64, 128>}, {pipeline_mode = #tpu.pipeline_mode<synchronous>, transform_indices = @transform_2, window_bounds = array<i64: 1, 128>}, {pipeline_mode = #tpu.pipeline_mode<synchronous>, transform_indices = @transform_3, window_bounds = array<i64: 128, 16>}, {pipeline_mode = #tpu.pipeline_mode<synchronous>, transform_indices = @transform_4, window_bounds = array<i64: 1, 16>}, {pipeline_mode = #tpu.pipeline_mode<synchronous>, transform_indices = @transform_5, window_bounds = array<i64: 16, 128>}, {pipeline_mode = #tpu.pipeline_mode<synchronous>, transform_indices = @transform_6, window_bounds = array<i64: 1, 128>}, {pipeline_mode = #tpu.pipeline_mode<synchronous>, transform_indices = @transform_7, window_bounds = array<i64: 128, 64>}, {pipeline_mode = #tpu.pipeline_mode<synchronous>, transform_indices = @transform_8, window_bounds = array<i64: 1, 64>}, {transform_indices = @transform_9, window_bounds = array<i64: 8, 64>}, {transform_indices = @transform_10, window_bounds = array<i64: 8, 16>}]} {
    %c0 = arith.constant 0 : index
    %c0_0 = arith.constant 0 : index
    %0 = vector.load %arg1[%c0, %c0_0] : memref<8x64xf32, #tpu.memory_space<vmem>>, vector<8x64xf32>
    %c0_1 = arith.constant 0 : index
    %c0_2 = arith.constant 0 : index
    %1 = vector.load %arg2[%c0_1, %c0_2] : memref<64x128xf32, #tpu.memory_space<vmem>>, vector<64x128xf32>
    %c0_3 = arith.constant 0 : index
    %c0_4 = arith.constant 0 : index
    %2 = vector.load %arg3[%c0_3, %c0_4] : memref<1x128xf32, #tpu.memory_space<vmem>>, vector<1x128xf32>
    %cst = arith.constant dense<0.000000e+00> : vector<8x128xf32>
    %3 = tpu.matmul %0, %1, %cst {dimension_numbers = #tpu.dot_dimension_numbers<[1], [0], [0], [1], [0, 0, 1, 1], [], []>} : vector<8x64xf32>, vector<64x128xf32>, vector<8x128xf32> -> vector<8x128xf32>
    %4 = vector.broadcast %2 : vector<1x128xf32> to vector<8x128xf32>
    %5 = arith.addf %3, %4 : vector<8x128xf32>
    %cst_5 = arith.constant 0.000000e+00 : f32
    %6 = vector.broadcast %cst_5 : f32 to vector<8x128xf32>
    %7 = arith.maximumf %5, %6 : vector<8x128xf32>
    %c0_6 = arith.constant 0 : index
    %c0_7 = arith.constant 0 : index
    %8 = vector.load %arg4[%c0_6, %c0_7] : memref<128x16xf32, #tpu.memory_space<vmem>>, vector<128x16xf32>
    %c0_8 = arith.constant 0 : index
    %c0_9 = arith.constant 0 : index
    %9 = vector.load %arg5[%c0_8, %c0_9] : memref<1x16xf32, #tpu.memory_space<vmem>>, vector<1x16xf32>
    %cst_10 = arith.constant dense<0.000000e+00> : vector<8x16xf32>
    %10 = tpu.matmul %7, %8, %cst_10 {dimension_numbers = #tpu.dot_dimension_numbers<[1], [0], [0], [1], [0, 0, 1, 1], [], []>} : vector<8x128xf32>, vector<128x16xf32>, vector<8x16xf32> -> vector<8x16xf32>
    %11 = vector.broadcast %9 : vector<1x16xf32> to vector<8x16xf32>
    %12 = arith.addf %10, %11 : vector<8x16xf32>
    %cst_11 = arith.constant 0.000000e+00 : f32
    %13 = vector.broadcast %cst_11 : f32 to vector<8x16xf32>
    %14 = arith.maximumf %12, %13 : vector<8x16xf32>
    %c0_12 = arith.constant 0 : index
    %c0_13 = arith.constant 0 : index
    %15 = vector.load %arg11[%c0_12, %c0_13] : memref<8x16xf32, #tpu.memory_space<vmem>>, vector<8x16xf32>
    tpu.vector_store %arg11[%c0_12, %c0_13], %14 {strides = array<i32>} : memref<8x16xf32, #tpu.memory_space<vmem>>, vector<8x16xf32>,
    %c0_14 = arith.constant 0 : index
    %c0_15 = arith.constant 0 : index
    %16 = vector.load %arg6[%c0_14, %c0_15] : memref<16x128xf32, #tpu.memory_space<vmem>>, vector<16x128xf32>
    %c0_16 = arith.constant 0 : index
    %c0_17 = arith.constant 0 : index
    %17 = vector.load %arg7[%c0_16, %c0_17] : memref<1x128xf32, #tpu.memory_space<vmem>>, vector<1x128xf32>
    %cst_18 = arith.constant dense<0.000000e+00> : vector<8x128xf32>
    %18 = tpu.matmul %14, %16, %cst_18 {dimension_numbers = #tpu.dot_dimension_numbers<[1], [0], [0], [1], [0, 0, 1, 1], [], []>} : vector<8x16xf32>, vector<16x128xf32>, vector<8x128xf32> -> vector<8x128xf32>
    %19 = vector.broadcast %17 : vector<1x128xf32> to vector<8x128xf32>
    %20 = arith.addf %18, %19 : vector<8x128xf32>
    %cst_19 = arith.constant 0.000000e+00 : f32
    %21 = vector.broadcast %cst_19 : f32 to vector<8x128xf32>
    %22 = arith.maximumf %20, %21 : vector<8x128xf32>
    %c0_20 = arith.constant 0 : index
    %c0_21 = arith.constant 0 : index
    %23 = vector.load %arg8[%c0_20, %c0_21] : memref<128x64xf32, #tpu.memory_space<vmem>>, vector<128x64xf32>
    %c0_22 = arith.constant 0 : index
    %c0_23 = arith.constant 0 : index
    %24 = vector.load %arg9[%c0_22, %c0_23] : memref<1x64xf32, #tpu.memory_space<vmem>>, vector<1x64xf32>
    %cst_24 = arith.constant dense<0.000000e+00> : vector<8x64xf32>
    %25 = tpu.matmul %22, %23, %cst_24 {dimension_numbers = #tpu.dot_dimension_numbers<[1], [0], [0], [1], [0, 0, 1, 1], [], []>} : vector<8x128xf32>, vector<128x64xf32>, vector<8x64xf32> -> vector<8x64xf32>
    %26 = vector.broadcast %24 : vector<1x64xf32> to vector<8x64xf32>
    %27 = arith.addf %25, %26 : vector<8x64xf32>
    %cst_25 = arith.constant 0.000000e+00 : f32
    %28 = vector.broadcast %cst_25 : f32 to vector<8x64xf32>
    %29 = arith.maximumf %27, %28 : vector<8x64xf32>
    %c0_26 = arith.constant 0 : index
    %c0_27 = arith.constant 0 : index
    %30 = vector.load %arg10[%c0_26, %c0_27] : memref<8x64xf32, #tpu.memory_space<vmem>>, vector<8x64xf32>
    tpu.vector_store %arg10[%c0_26, %c0_27], %29 {strides = array<i32>} : memref<8x64xf32, #tpu.memory_space<vmem>>, vector<8x64xf32>,
    return
  }
  func.func @transform_0(%arg0: i32) -> (i32, i32) {
    %c0_i32 = arith.constant 0 : i32
    %c0_i32_0 = arith.constant 0 : i32
    return %arg0, %c0_i32 : i32, i32
  }
  func.func @transform_1(%arg0: i32) -> (i32, i32) {
    %c0_i32 = arith.constant 0 : i32
    %c0_i32_0 = arith.constant 0 : i32
    %c0_i32_1 = arith.constant 0 : i32
    return %c0_i32, %c0_i32_0 : i32, i32
  }
  func.func @transform_2(%arg0: i32) -> (i32, i32) {
    %c0_i32 = arith.constant 0 : i32
    %c0_i32_0 = arith.constant 0 : i32
    %c0_i32_1 = arith.constant 0 : i32
    return %c0_i32, %c0_i32_0 : i32, i32
  }
  func.func @transform_3(%arg0: i32) -> (i32, i32) {
    %c0_i32 = arith.constant 0 : i32
    %c0_i32_0 = arith.constant 0 : i32
    %c0_i32_1 = arith.constant 0 : i32
    return %c0_i32, %c0_i32_0 : i32, i32
  }
  func.func @transform_4(%arg0: i32) -> (i32, i32) {
    %c0_i32 = arith.constant 0 : i32
    %c0_i32_0 = arith.constant 0 : i32
    %c0_i32_1 = arith.constant 0 : i32
    return %c0_i32, %c0_i32_0 : i32, i32
  }
  func.func @transform_5(%arg0: i32) -> (i32, i32) {
    %c0_i32 = arith.constant 0 : i32
    %c0_i32_0 = arith.constant 0 : i32
    %c0_i32_1 = arith.constant 0 : i32
    return %c0_i32, %c0_i32_0 : i32, i32
  }
  func.func @transform_6(%arg0: i32) -> (i32, i32) {
    %c0_i32 = arith.constant 0 : i32
    %c0_i32_0 = arith.constant 0 : i32
    %c0_i32_1 = arith.constant 0 : i32
    return %c0_i32, %c0_i32_0 : i32, i32
  }
  func.func @transform_7(%arg0: i32) -> (i32, i32) {
    %c0_i32 = arith.constant 0 : i32
    %c0_i32_0 = arith.constant 0 : i32
    %c0_i32_1 = arith.constant 0 : i32
    return %c0_i32, %c0_i32_0 : i32, i32
  }
  func.func @transform_8(%arg0: i32) -> (i32, i32) {
    %c0_i32 = arith.constant 0 : i32
    %c0_i32_0 = arith.constant 0 : i32
    %c0_i32_1 = arith.constant 0 : i32
    return %c0_i32, %c0_i32_0 : i32, i32
  }
  func.func @transform_9(%arg0: i32) -> (i32, i32) {
    %c0_i32 = arith.constant 0 : i32
    %c0_i32_0 = arith.constant 0 : i32
    return %arg0, %c0_i32 : i32, i32
  }
  func.func @transform_10(%arg0: i32) -> (i32, i32) {
    %c0_i32 = arith.constant 0 : i32
    %c0_i32_0 = arith.constant 0 : i32
    return %arg0, %c0_i32 : i32, i32
  }
}

</mosaic_0001>

<bundles_post_ra>
// kernel: tpu_custom_call.1
= control target key start
LH: loop header
LB: loop body
LE: loop exit
PB: predicated region body
PF: predicated region fallthrough
CT: control target
= control target key end

     0   :  { %16 = vsyncpa [#allocation3], 0  ;;  %v625_v1 = vmov 0.0   ;;  %vm626_vm0 = vmmov 0   ;;  %s883_s0 = inlined_call_operand.vmem [shape: f32[8,64], index: 0, kind: input, shape index: {}]   ;;  %s884_s1 = inlined_call_operand.vmem [shape: f32[64,128], index: 1, kind: input, shape index: {}]   ;;  %s885_s2 = inlined_call_operand.vmem [shape: f32[1,128], index: 2, kind: input, shape index: {}]   ;;  %s886_s3 = inlined_call_operand.vmem [shape: f32[128,16], index: 3, kind: input, shape index: {}]   ;;  %s887_s4 = inlined_call_operand.vmem [shape: f32[1,16], index: 4, kind: input, shape index: {}]   ;;  %s888_s5 = inlined_call_operand.vmem [shape: f32[16,128], index: 5, kind: input, shape index: {}]   ;;  %s889_s6 = inlined_call_operand.vmem [shape: f32[1,128], index: 6, kind: input, shape index: {}]   ;;  %s890_s7 = inlined_call_operand.vmem [shape: f32[128,64], index: 7, kind: input, shape index: {}]   ;;  %s891_s8 = inlined_call_operand.vmem [shape: f32[1,64], index: 8, kind: input, shape index: {}]   ;;  %s892_s9 = inlined_call_operand.hbm [shape: f32[8,64], index: 9, kind: output, shape index: {0}]   ;;  %s893_s10 = inlined_call_operand.hbm [shape: f32[8,16], index: 10, kind: output, shape index: {1}]  }
   0x1   :  { %v44_v0 = vld [vmem:[%s884_s1 + $0x38] sm:$0xff]  ;;  %481 = vmatprep.subr.mxu1 %v625_v1  ;;  %v43_v2 = vld [vmem:[%s884_s1 + $0x30] sm:$0xff]  ;;  %497 = vmatprep.mubr.msk.f32.mxu1 %vm626_vm0, %v625_v1  ;;  %v42_v3 = vld [vmem:[%s884_s1 + $0x28] sm:$0xff] }
   0x2   :  { %482 = vmatpush3.msra.mxu1 %v44_v0  ;;  %535 = vmatprep.subr.mxu0 %v625_v1  ;;  %v41_v4 = vld [vmem:[%s884_s1 + $0x20] sm:$0xff]  ;;  %v40_v5 = vld [vmem:[%s884_s1 + $0x18] sm:$0xff] }
   0x3   :  { %483 = vmatprep.subr.mxu1 %v625_v1  ;;  %539 = vmatprep.mubr.msk.f32.mxu0 %vm626_vm0, %v625_v1 }
   0x4   :  { %484 = vmatpush3.msra.mxu1 %v43_v2 }
   0x5   :  { %485 = vmatprep.subr.mxu1 %v625_v1 }
   0x6   :  { %486 = vmatpush3.msra.mxu1 %v42_v3 }
   0x7   :  { %487 = vmatprep.subr.mxu1 %v625_v1 }
   0x8   :  { %17 = vsyncpa [#allocation5], 0  ;;  %488 = vmatpush3.msra.mxu1 %v41_v4  ;;  %v39_v6 = vld [vmem:[%s884_s1 + $0x10] sm:$0xff]  ;;  %v38_v7 = vld [vmem:[%s884_s1 + $0x8] sm:$0xff]  ;;  %vm52_vm1 = vcmask 523264   ;;  %vm221_vm2 = vcmask 130048  }
   0x9   :  { %489 = vmatprep.subr.mxu1 %v625_v1  ;;  %v37_v8 = vld [vmem:[%s884_s1] sm:$0xff]  ;;  %v142_v10 = vld [vmem:[%s886_s3 + $0x78] sm:$0xff]  ;;  %v141_v11 = vld [vmem:[%s886_s3 + $0x70] sm:$0xff]  ;;  %s627_s11 = smov [#allocation4]  }
   0xa   :  { %490 = vmatpush3.msra.mxu1 %v40_v5  ;;  %v36_v9 = vld [vmem:[%s883_s0] sm:$0xff]  ;;  %v140_v12 = vld [vmem:[%s886_s3 + $0x68] sm:$0xff]  ;;  %v138_v14 = vld [vmem:[%s886_s3 + $0x58] sm:$0xff]  ;;  %s417_s12 = sshll.u32 %s627_s11, 4  ;;  %s418_s12 = int_to_ptr.vmem [resolvable:$true] %s417_s12 }
   0xb   :  { %491 = vmatprep.subr.mxu1 %v625_v1  ;;  %v139_v13 = vld [vmem:[%s886_s3 + $0x60] sm:$0xff]  ;;  %v137_v15 = vld [vmem:[%s886_s3 + $0x50] sm:$0xff]  ;;  %v136_v16 = vld [vmem:[%s886_s3 + $0x48] sm:$0xff]  ;;  %s581_s13 = scalar_lea.vmem %s418_s12, 128  ;;  %p586_p1 = scmp.lt.s32.totalorder %s418_s12, %s418_s12 }
   0xc   :  { %492 = vmatpush3.msra.mxu1 %v39_v6  ;;  %v135_v17 = vld [vmem:[%s886_s3 + $0x40] sm:$0xff]  ;;  %v134_v18 = vld [vmem:[%s886_s3 + $0x38] sm:$0xff]  ;;  %v133_v19 = vld [vmem:[%s886_s3 + $0x30] sm:$0xff]  ;;  %p582_p0 = scmp.ne.s32.totalorder %s418_s12, %s581_s13  ;;  %p587_p2 = scmp.lt.s32.totalorder %s581_s13, %s581_s13 }
   0xd   :  { %493 = vmatprep.subr.mxu1 %v625_v1  ;;  %v132_v20 = vld [vmem:[%s886_s3 + $0x28] sm:$0xff]  ;;  %v131_v21 = vld [vmem:[%s886_s3 + $0x20] sm:$0xff]  ;;  %v130_v22 = vld [vmem:[%s886_s3 + $0x18] sm:$0xff] }
   0xe   :  { %494 = vmatpush3.msra.mxu1 %v38_v7  ;;  %v129_v23 = vld [vmem:[%s886_s3 + $0x10] sm:$0xff]  ;;  %v128_v24 = vld [vmem:[%s886_s3 + $0x8] sm:$0xff]  ;;  %v127_v25 = vld [vmem:[%s886_s3] sm:$0xff]  ;;  %p588_p3 = por %p587_p2, %p586_p1 }
   0xf   :  { %495 = vmatprep.subr.mxu1 %v625_v1  ;;  %v429_v26 = vld [vmem:[%s885_s2] ss:$0 sm:$0xff]  ;;  %v224_v31 = vld [vmem:[%s888_s5 + $0x8] sm:$0xff]  ;;  %v321_v38 = vld [vmem:[%s890_s7 + $0x78] sm:$0xff] }
  0x10   :  { %496 = vmatpush3.msra.mxu1 %v37_v8  ;;  %536 = vmatpush3.msra.mxu0 %v224_v31  ;;  %v223_v32 = vld [vmem:[%s888_s5] sm:$0xff]  ;;  %v320_v39 = vld [vmem:[%s890_s7 + $0x70] sm:$0xff]  ;;  %v319_v40 = vld [vmem:[%s890_s7 + $0x68] sm:$0xff]  ;;  %p589_p4 = pnand %p588_p3, %p582_p0 }
  0x11   :  { %498 = vmatmul.mubr.msk.f32.vlgmr.msra.gmra.mxu1 %vm52_vm1, %v36_v9  ;;  %500 = vmatprep.subr.mxu1 %v625_v1  ;;  %v431_v33 = vld [vmem:[%s887_s4] ss:$0 sm:$0xff]  ;;  %v317_v42 = vld [vmem:[%s890_s7 + $0x58] sm:$0xff]  ;;  %v316_v43 = vld [vmem:[%s890_s7 + $0x50] sm:$0xff] }
  0x12   :  { %501 = vmatpush3.msra.mxu1 %v142_v10  ;;  %532 = vmatprep.mubr.msk.f32.mxu1 %vm626_vm0, %v625_v1  ;;  %v318_v41 = vld [vmem:[%s890_s7 + $0x60] sm:$0xff]  ;;  %v315_v44 = vld [vmem:[%s890_s7 + $0x48] sm:$0xff]  ;;  %v313_v46 = vld [vmem:[%s890_s7 + $0x38] sm:$0xff] }
  0x13   :  { %502 = vmatprep.subr.mxu1 %v625_v1  ;;  %537 = vmatprep.subr.mxu0 %v625_v1  ;;  %v314_v45 = vld [vmem:[%s890_s7 + $0x40] sm:$0xff]  ;;  %v312_v47 = vld [vmem:[%s890_s7 + $0x30] sm:$0xff]  ;;  %v311_v48 = vld [vmem:[%s890_s7 + $0x28] sm:$0xff] }
  0x14   :  { %503 = vmatpush3.msra.mxu1 %v141_v11  ;;  %538 = vmatpush3.msra.mxu0 %v223_v32  ;;  %v310_v49 = vld [vmem:[%s890_s7 + $0x20] sm:$0xff]  ;;  %v309_v50 = vld [vmem:[%s890_s7 + $0x18] sm:$0xff]  ;;  %v308_v51 = vld [vmem:[%s890_s7 + $0x10] sm:$0xff] }
  0x15   :  { %504 = vmatprep.subr.mxu1 %v625_v1  ;;  %542 = vmatprep.subr.mxu0 %v625_v1  ;;  %v307_v52 = vld [vmem:[%s890_s7 + $0x8] sm:$0xff]  ;;  %v306_v53 = vld [vmem:[%s890_s7] sm:$0xff] }
  0x16   :  { %505 = vmatpush3.msra.mxu1 %v140_v12  ;;  %v432_v54 = vld [vmem:[%s889_s6] ss:$0 sm:$0xff] }
  0x17   :  { %506 = vmatprep.subr.mxu1 %v625_v1 }
  0x18   :  { %507 = vmatpush3.msra.mxu1 %v139_v13 }
  0x19   :  { %508 = vmatprep.subr.mxu1 %v625_v1 }
  0x1a   :  { %509 = vmatpush3.msra.mxu1 %v138_v14 }
  0x1b   :  { %510 = vmatprep.subr.mxu1 %v625_v1 }
  0x1c   :  { %511 = vmatpush3.msra.mxu1 %v137_v15 }
  0x1d   :  { %512 = vmatprep.subr.mxu1 %v625_v1 }
  0x1e   :  { %513 = vmatpush3.msra.mxu1 %v136_v16 }
  0x1f   :  { %514 = vmatprep.subr.mxu1 %v625_v1 }
  0x20   :  { %515 = vmatpush3.msra.mxu1 %v135_v17 }
  0x21   :  { %516 = vmatprep.subr.mxu1 %v625_v1 }
  0x22   :  { %517 = vmatpush3.msra.mxu1 %v134_v18 }
  0x23   :  { %518 = vmatprep.subr.mxu1 %v625_v1 }
  0x24   :  { %519 = vmatpush3.msra.mxu1 %v133_v19 }
  0x25   :  { %520 = vmatprep.subr.mxu1 %v625_v1 }
  0x26   :  { %521 = vmatpush3.msra.mxu1 %v132_v20 }
  0x27   :  { %522 = vmatprep.subr.mxu1 %v625_v1 }
  0x28   :  { %523 = vmatpush3.msra.mxu1 %v131_v21 }
  0x29   :  { %524 = vmatprep.subr.mxu1 %v625_v1 }
  0x2a   :  { %525 = vmatpush3.msra.mxu1 %v130_v22 }
  0x2b   :  { %526 = vmatprep.subr.mxu1 %v625_v1 }
  0x2c   :  { %527 = vmatpush3.msra.mxu1 %v129_v23 }
  0x2d   :  { %528 = vmatprep.subr.mxu1 %v625_v1 }
  0x2e   :  { %529 = vmatpush3.msra.mxu1 %v128_v24 }
  0x2f   :  { %530 = vmatprep.subr.mxu1 %v625_v1 }
  0x30   :  { %531 = vmatpush3.msra.mxu1 %v127_v25 }
  0xd1   :  { %v122_v27 = vpop.f32.mrf.mxu1 }
  0xd2   :  { %v123_v28 = vadd.f32 %v429_v26, %v122_v27 }
  0xd3   :  { %v499_v29 = vpop.f32.mrf.mxu1 }
  0xd4   :  { %v126_v30 = vmax.f32 %v123_v28, 0.0 }
  0xd6   :  { %533 = vmatmul.mubr.f32.vlgmr.msra.gmra.mxu1 %v126_v30 }
 0x196   :  { %v216_v34 = vpop.f32.mrf.mxu1 }
 0x197   :  { %v217_v35 = vadd.f32 %v431_v33, %v216_v34 }
 0x198   :  { %v534_v36 = vpop.f32.mrf.mxu1 }
 0x199   :  { %v220_v37 = vmax.f32 %v217_v35, 0.0 }
 0x19b   :  { %540 = vmatmul.mubr.msk.f32.vlgmr.msra.gmra.mxu0 %vm221_vm2, %v220_v37  ;;  %222 = vst.msk [vmem:[#allocation4] sm:$0xff] %vm221_vm2, %v220_v37 }
 0x19c   :  { %543 = vmatpush3.msra.mxu0 %v321_v38  ;;  %574 = vmatprep.mubr.msk.f32.mxu0 %vm626_vm0, %v625_v1 }
 0x19d   :  { %544 = vmatprep.subr.mxu0 %v625_v1 }
 0x19e   :  { %545 = vmatpush3.msra.mxu0 %v320_v39 }
 0x19f   :  { %546 = vmatprep.subr.mxu0 %v625_v1 }
 0x1a0   :  { %547 = vmatpush3.msra.mxu0 %v319_v40 }
 0x1a1   :  { %548 = vmatprep.subr.mxu0 %v625_v1 }
 0x1a2   :  { %549 = vmatpush3.msra.mxu0 %v318_v41 }
 0x1a3   :  { %550 = vmatprep.subr.mxu0 %v625_v1 }
 0x1a4   :  { %551 = vmatpush3.msra.mxu0 %v317_v42 }
 0x1a5   :  { %552 = vmatprep.subr.mxu0 %v625_v1 }
 0x1a6   :  { %553 = vmatpush3.msra.mxu0 %v316_v43 }
 0x1a7   :  { %554 = vmatprep.subr.mxu0 %v625_v1 }
 0x1a8   :  { %555 = vmatpush3.msra.mxu0 %v315_v44 }
 0x1a9   :  { %556 = vmatprep.subr.mxu0 %v625_v1 }
 0x1aa   :  { %557 = vmatpush3.msra.mxu0 %v314_v45 }
 0x1ab   :  { %558 = vmatprep.subr.mxu0 %v625_v1 }
 0x1ac   :  { %559 = vmatpush3.msra.mxu0 %v313_v46 }
 0x1ad   :  { %560 = vmatprep.subr.mxu0 %v625_v1 }
 0x1ae   :  { %561 = vmatpush3.msra.mxu0 %v312_v47 }
 0x1af   :  { %562 = vmatprep.subr.mxu0 %v625_v1 }
 0x1b0   :  { %563 = vmatpush3.msra.mxu0 %v311_v48 }
 0x1b1   :  { %564 = vmatprep.subr.mxu0 %v625_v1 }
 0x1b2   :  { %565 = vmatpush3.msra.mxu0 %v310_v49 }
 0x1b3   :  { %566 = vmatprep.subr.mxu0 %v625_v1 }
 0x1b4   :  { %567 = vmatpush3.msra.mxu0 %v309_v50 }
 0x1b5   :  { %568 = vmatprep.subr.mxu0 %v625_v1 }
 0x1b6   :  { %569 = vmatpush3.msra.mxu0 %v308_v51 }
 0x1b7   :  { %570 = vmatprep.subr.mxu0 %v625_v1 }
 0x1b8   :  { %571 = vmatpush3.msra.mxu0 %v307_v52 }
 0x1b9   :  { %572 = vmatprep.subr.mxu0 %v625_v1 }
 0x1ba   :  { %573 = vmatpush3.msra.mxu0 %v306_v53 }
 0x25b   :  { %v301_v55 = vpop.f32.mrf.mxu0 }
 0x25c   :  { %v302_v56 = vadd.f32 %v432_v54, %v301_v55 }
 0x25d   :  { %v541_v57 = vpop.f32.mrf.mxu0 }
 0x25e   :  { %v305_v58 = vmax.f32 %v302_v56, 0.0 }
 0x260   :  { %575 = vmatmul.mubr.f32.vlgmr.msra.gmra.mxu0 %v305_v58 }
 0x261   :  { %592 = shalt.err (!%p589_p4)
}
 0x262   :  { %420 = dma.vmem_to_hbm [thread:$0]  %s418_s12, 128, %s893_s10, [#allocation5]   ;;  %v434_v59 = vld [vmem:[%s891_s8] ss:$0 sm:$0xff] }
 0x263   :  { %s628_s1 = smov [#allocation2]  }
 0x264   :  { %s407_s15 = sshll.u32 %s628_s1, 4  ;;  %s408_s15 = int_to_ptr.vmem [resolvable:$true] %s407_s15 }
 0x265   :  { %s601_s16 = scalar_lea.vmem %s408_s15, 128  ;;  %p606_p6 = scmp.lt.s32.totalorder %s408_s15, %s408_s15 }
 0x266   :  { %p602_p5 = scmp.ne.s32.totalorder %s408_s15, %s601_s16  ;;  %p607_p7 = scmp.lt.s32.totalorder %s601_s16, %s601_s16 }
 0x268   :  { %p608_p8 = por %p607_p7, %p606_p6 }
 0x26a   :  { %p609_p9 = pnand %p608_p8, %p602_p5 }
 0x320   :  { %v395_v60 = vpop.f32.mrf.mxu0 }
 0x321   :  { %v396_v61 = vadd.f32 %v434_v59, %v395_v60 }
 0x322   :  { %v576_v62 = vpop.f32.mrf.mxu0 }
 0x323   :  { %v399_v63 = vmax.f32 %v396_v61, 0.0 }
 0x325   :  { %400 = vst.msk [vmem:[#allocation2] sm:$0xff] %vm52_vm1, %v399_v63 }
 0x326   :  { %612 = shalt.err (!%p609_p9)
}
 0x327   :  { %410 = dma.vmem_to_hbm [thread:$0]  %s408_s15, 128, %s892_s9, [#allocation3]  }
 0x328   :  { %621 = dma.done.wait [#allocation3], 128  }
 0x329   :  { %622 = vsyncadd [#allocation3], 4294967168 }
 0x32a   :  { %623 = dma.done.wait [#allocation5], 128  }
 0x32b   :  { %624 = vsyncadd [#allocation5], 4294967168 }
 0x32c   :  { %427 = vsyncpa [#allocation3], 1 }
 0x32d   :  { %428 = vsyncpa [#allocation5], 1 }

</bundles_post_ra>
